<compile_context>
chip_gen: v6e
topology: v6e:2x2x1
jax: 0.10.0
libtpu: 0.0.40
codegen_flags: <defaults>
</compile_context>

<pallas_src>
import functools

import jax
import jax.numpy as jnp
import numpy as np
from jax.experimental import pallas as pl
from jax.experimental.pallas import tpu as pltpu


_STREAM_VMEM_BUDGET = 24 << 20   # double-buffered streamed tiles (v7x-safe)
_VMEM_LIMIT_CAP = 64 << 20       # never request more than v7x physical VMEM


def _nt_dot(a, b):
    """(P, C) x (M, C) -> (P, M), contracting the shared last (lane) dim."""
    return jax.lax.dot_general(
        a, b, (((1,), (1,)), ((), ())), preferred_element_type=jnp.float32)


def _mm(a, b):
    """(M, C) x (C, Q) -> (M, Q) standard MXU matmul."""
    return jax.lax.dot_general(
        a, b, (((1,), (0,)), ((), ())), preferred_element_type=jnp.float32)


def _bce_sigmoid_pieces(x):
    """neg = 0.5*softplus(x) (== 0.5*BCE(x, 0)) and sig = sigmoid(x).

    The `pos` term is folded away: softplus(-x) - softplus(x) == -x, applied as
    a single -0.5 scale of the x @ t.T accumulator in finalize.
    """
    abs_x = jnp.abs(x)
    e = jnp.exp(-abs_x)                          # exp(-|x|) in (0, 1]
    sp = jnp.log(1.0 + e)                        # softplus(-|x|)
    neg = 0.5 * (jnp.maximum(x, 0.0) + sp)
    inv = pl.reciprocal(1.0 + e, approx=True)    # EUP vrcp, separate slot
    sig = jnp.where(x >= 0.0, inv, e * inv)      # sigmoid(x)
    return neg, sig


# ---------------------------------------------------------------------------
# Query-major kernel (small Q): streamed tiles are (Q, tile_n) / (M, tile_n).
# ---------------------------------------------------------------------------
def _qmajor_kernel(logits_ref, onehot_ref, tsum_ref, pmask_ref, tmask_ref,
                   out_ref, acc_bce_ref, acc_dice_ref, neg_sum_ref, sig_sum_ref,
                   *, n_points, tile_n, num_full_tiles, has_partial,
                   w_class, w_mask, w_dice):
    step = pl.program_id(0)

    @pl.when(step == 0)
    def _init():
        acc_bce_ref[...] = jnp.zeros_like(acc_bce_ref)
        acc_dice_ref[...] = jnp.zeros_like(acc_dice_ref)
        neg_sum_ref[...] = jnp.zeros_like(neg_sum_ref)
        sig_sum_ref[...] = jnp.zeros_like(sig_sum_ref)

    x = pmask_ref[...].astype(jnp.float32)   # (Q, Tn) mask logits
    t = tmask_ref[...].astype(jnp.float32)   # (M, Tn) binary GT masks

    def accumulate(xv, tv, valid=None):
        neg, sig = _bce_sigmoid_pieces(xv)
        if valid is not None:
            neg = neg * valid
            sig = sig * valid
        acc_bce_ref[...] += _nt_dot(xv, tv)                      # x @ t.T
        acc_dice_ref[...] += _nt_dot(sig, tv)                    # sig @ t.T
        neg_sum_ref[...] += jnp.sum(neg, axis=-1, keepdims=True)
        sig_sum_ref[...] += jnp.sum(sig, axis=-1, keepdims=True)

    if not has_partial:
        accumulate(x, t)
    else:
        @pl.when(step < num_full_tiles)
        def _full():
            accumulate(x, t)

        @pl.when(step == num_full_tiles)       # the single partial tile
        def _partial():
            base = step * tile_n
            col_x = jax.lax.broadcasted_iota(jnp.int32, x.shape, 1) + base
            col_t = jax.lax.broadcasted_iota(jnp.int32, t.shape, 1) + base
            valid = (col_x < n_points).astype(jnp.float32)
            accumulate(jnp.where(col_x < n_points, x, 0.0),
                       jnp.where(col_t < n_points, t, 0.0), valid)

    @pl.when(step == pl.num_programs(0) - 1)
    def _finalize():
        logits = logits_ref[...].astype(jnp.float32)             # (Q, K)
        onehot = onehot_ref[...].astype(jnp.float32)             # (M, K)
        mx = jnp.max(logits, axis=-1, keepdims=True)
        ez = jnp.exp(logits - mx)
        prob = ez / jnp.sum(ez, axis=-1, keepdims=True)
        cost_class = -_nt_dot(prob, onehot)                      # (Q, M)

        # pos @ t.T + neg @ (1-t).T == -0.5 * x @ t.T + rowsum(neg)
        inv_n = 1.0 / float(n_points)
        cost_mask = (neg_sum_ref[...] - 0.5 * acc_bce_ref[...]) * inv_n

        numer = 2.0 * acc_dice_ref[...]
        denom = sig_sum_ref[...] + tsum_ref[...]                 # (Q,1)+(1,M)
        cost_dice = 1.0 - (numer + 1.0) / (denom + 1.0)

        out_ref[...] = (w_class * cost_class + w_mask * cost_mask +
                        w_dice * cost_dice).astype(out_ref.dtype)


# ---------------------------------------------------------------------------
# Point-major kernel (Q >= 128): native (N, Q) layout, no wrapper transpose.
# Grid = (Q-blocks [parallel], N-tiles [arbitrary]); accumulates (M, Qb).
# ---------------------------------------------------------------------------
def _pmajor_kernel(logits_ref, onehot_ref, tsum_ref, pmask_ref, tmask_ref,
                   out_ref, acc_bce_ref, acc_dice_ref, neg_sum_ref, sig_sum_ref,
                   *, n_points, tile_n, num_full_tiles, has_partial,
                   w_class, w_mask, w_dice):
    step = pl.program_id(1)          # reduction axis over point tiles

    @pl.when(step == 0)
    def _init():
        acc_bce_ref[...] = jnp.zeros_like(acc_bce_ref)
        acc_dice_ref[...] = jnp.zeros_like(acc_dice_ref)
        neg_sum_ref[...] = jnp.zeros_like(neg_sum_ref)
        sig_sum_ref[...] = jnp.zeros_like(sig_sum_ref)

    x = pmask_ref[...].astype(jnp.float32)   # (Tn, Qb) native-layout logits
    t = tmask_ref[...].astype(jnp.float32)   # (M, Tn) binary GT masks

    def accumulate(xv, tv, valid=None):
        neg, sig = _bce_sigmoid_pieces(xv)
        if valid is not None:
            neg = neg * valid
            sig = sig * valid
        acc_bce_ref[...] += _mm(tv, xv)                          # (M, Qb)
        acc_dice_ref[...] += _mm(tv, sig)                        # (M, Qb)
        neg_sum_ref[...] += jnp.sum(neg, axis=0, keepdims=True)  # (1, Qb)
        sig_sum_ref[...] += jnp.sum(sig, axis=0, keepdims=True)

    if not has_partial:
        accumulate(x, t)
    else:
        @pl.when(step < num_full_tiles)
        def _full():
            accumulate(x, t)

        @pl.when(step == num_full_tiles)       # the single partial tile
        def _partial():
            base = step * tile_n
            row_x = jax.lax.broadcasted_iota(jnp.int32, x.shape, 0) + base
            col_t = jax.lax.broadcasted_iota(jnp.int32, t.shape, 1) + base
            valid = (row_x < n_points).astype(jnp.float32)
            accumulate(jnp.where(row_x < n_points, x, 0.0),
                       jnp.where(col_t < n_points, t, 0.0), valid)

    @pl.when(step == pl.num_programs(1) - 1)
    def _finalize():
        logits = logits_ref[...].astype(jnp.float32)             # (Qb, K)
        onehot = onehot_ref[...].astype(jnp.float32)             # (M, K)
        mx = jnp.max(logits, axis=-1, keepdims=True)
        ez = jnp.exp(logits - mx)
        prob = ez / jnp.sum(ez, axis=-1, keepdims=True)
        cost_class = -_nt_dot(onehot, prob)                      # (M, Qb)

        inv_n = 1.0 / float(n_points)
        cost_mask = (neg_sum_ref[...] - 0.5 * acc_bce_ref[...]) * inv_n

        numer = 2.0 * acc_dice_ref[...]
        denom = sig_sum_ref[...] + tsum_ref[...]                 # (1,Qb)+(M,1)
        cost_dice = 1.0 - (numer + 1.0) / (denom + 1.0)

        out_ref[...] = (w_class * cost_class + w_mask * cost_mask +
                        w_dice * cost_dice).astype(out_ref.dtype)


# ---------------------------------------------------------------------------
# Wrappers
# ---------------------------------------------------------------------------
def _select_tile(n_points, requested, per_col_bytes):
    """Tile length along the point axis: biggest 128-multiple under budget."""
    cap = max(128, (_STREAM_VMEM_BUDGET // (2 * per_col_bytes)) // 128 * 128)
    tn = max(128, (min(int(requested), cap) // 128) * 128)
    if n_points <= tn:
        return n_points, 1, 0, False          # single full-array tile
    grid_n = pl.cdiv(n_points, tn)
    num_full = n_points // tn
    return tn, grid_n, num_full, (n_points % tn) != 0


def _vmem_limit_bytes(stream_bytes, acc_bytes, out_bytes, const_bytes):
    est = 2 * stream_bytes + 2 * out_bytes + acc_bytes + const_bytes + (2 << 20)
    return int(min(_VMEM_LIMIT_CAP, max(32 << 20, 2 * est)))


def matcher_cost_matrix(pred_logits_b, pred_mask_nq, gt_labels_b, gt_mask_b,
                        cost_weight, *, tile_n=8192):
    """Fused per-batch Hungarian cost matrix, returned as (Q, M) float32.

    pred_logits_b: (Q, K) class logits; pred_mask_nq: (N, Q) per-point mask
    logits in their NATIVE layout; gt_labels_b: (M,) int labels;
    gt_mask_b: (M, N) binary masks.
    """
    Q, K = pred_logits_b.shape
    N, Q2 = pred_mask_nq.shape
    M, N2 = gt_mask_b.shape
    assert Q2 == Q and N2 == N

    w_class = float(cost_weight[0])
    w_mask = float(cost_weight[1])
    w_dice = float(cost_weight[2])

    onehot = jax.nn.one_hot(jnp.asarray(gt_labels_b, jnp.int32), K,
                            dtype=jnp.float32)                    # (M, K)
    # GT point counts, precomputed once (replaces the per-step ones-matmul).
    tgt_sum = jnp.sum(gt_mask_b.astype(jnp.float32), axis=-1)     # (M,)

    # 0/1 GT masks are exact in bf16: stream non-float masks at half the bytes.
    if gt_mask_b.dtype not in (jnp.float32, jnp.bfloat16, jnp.float16):
        gt_mask_b = gt_mask_b.astype(jnp.bfloat16)
    x_item = jnp.dtype(pred_mask_nq.dtype).itemsize
    t_item = jnp.dtype(gt_mask_b.dtype).itemsize

    point_major = (Q >= 128) and (Q % 128 == 0)

    if point_major:
        qb = 128                                   # parallel Q blocks (v7x TCs)
        num_q = Q // qb
        per_col = qb * x_item + M * t_item
        tn, grid_n, num_full, has_partial = _select_tile(N, tile_n, per_col)
        kernel = functools.partial(
            _pmajor_kernel, n_points=N, tile_n=tn, num_full_tiles=num_full,
            has_partial=has_partial, w_class=w_class, w_mask=w_mask,
            w_dice=w_dice)
        limit = _vmem_limit_bytes(per_col * tn, 4 * (2 * M * qb + 2 * qb),
                                  4 * M * qb, 4 * (qb * K + M * K + M))
        cost_mq = pl.pallas_call(
            kernel,
            out_shape=jax.ShapeDtypeStruct((M, Q), jnp.float32),
            grid_spec=pltpu.PrefetchScalarGridSpec(
                num_scalar_prefetch=0,
                grid=(num_q, grid_n),
                in_specs=[
                    pl.BlockSpec((qb, K), lambda q, n: (q, 0)),   # class logits
                    pl.BlockSpec((M, K), lambda q, n: (0, 0)),    # label one-hot
                    pl.BlockSpec((M, 1), lambda q, n: (0, 0)),    # GT point counts
                    pl.BlockSpec((tn, qb), lambda q, n: (n, q)),  # mask logits
                    pl.BlockSpec((M, tn), lambda q, n: (0, n)),   # GT masks
                ],
                out_specs=pl.BlockSpec((M, qb), lambda q, n: (0, q)),
                scratch_shapes=[
                    pltpu.VMEM((M, qb), jnp.float32),   # t @ x accumulator
                    pltpu.VMEM((M, qb), jnp.float32),   # t @ sigmoid accumulator
                    pltpu.VMEM((1, qb), jnp.float32),   # colsum(neg)
                    pltpu.VMEM((1, qb), jnp.float32),   # colsum(sigmoid)
                ]),
            compiler_params=pltpu.CompilerParams(
                dimension_semantics=("parallel", "arbitrary"),
                vmem_limit_bytes=limit),
        )(pred_logits_b, onehot, tgt_sum.reshape(M, 1), pred_mask_nq, gt_mask_b)
        return cost_mq.T       # tiny (M, Q) -> (Q, M), one cheap XLA transpose

    # Small-Q fallback: one up-front transpose keeps streamed pred tiles
    # lane-dense (Q, tile_n); for Q >= 128 the path above avoids it entirely.
    pmask_qn = pred_mask_nq.T
    per_col = Q * x_item + M * t_item
    tn, grid_n, num_full, has_partial = _select_tile(N, tile_n, per_col)
    kernel = functools.partial(
        _qmajor_kernel, n_points=N, tile_n=tn, num_full_tiles=num_full,
        has_partial=has_partial, w_class=w_class, w_mask=w_mask, w_dice=w_dice)
    limit = _vmem_limit_bytes(per_col * tn, 4 * (2 * Q * M + 2 * Q),
                              4 * Q * M, 4 * (Q * K + M * K + M))
    return pl.pallas_call(
        kernel,
        out_shape=jax.ShapeDtypeStruct((Q, M), jnp.float32),
        grid_spec=pltpu.PrefetchScalarGridSpec(
            num_scalar_prefetch=0,
            grid=(grid_n,),
            in_specs=[
                pl.BlockSpec((Q, K), lambda n: (0, 0)),   # class logits (tiny)
                pl.BlockSpec((M, K), lambda n: (0, 0)),   # label one-hot (tiny)
                pl.BlockSpec((1, M), lambda n: (0, 0)),   # GT point counts
                pl.BlockSpec((Q, tn), lambda n: (0, n)),  # streamed mask logits
                pl.BlockSpec((M, tn), lambda n: (0, n)),  # streamed GT masks
            ],
            out_specs=pl.BlockSpec((Q, M), lambda n: (0, 0)),
            scratch_shapes=[
                pltpu.VMEM((Q, M), jnp.float32),   # x @ t.T accumulator
                pltpu.VMEM((Q, M), jnp.float32),   # sigmoid @ t.T accumulator
                pltpu.VMEM((Q, 1), jnp.float32),   # rowsum(neg)
                pltpu.VMEM((Q, 1), jnp.float32),   # rowsum(sigmoid)
            ]),
        compiler_params=pltpu.CompilerParams(
            dimension_semantics=("arbitrary",),
            vmem_limit_bytes=limit),
    )(pred_logits_b, onehot, tgt_sum.reshape(1, M), pmask_qn, gt_mask_b)


def hungarian_matcher_forward(pred, target, cost_weight, *, tile_n=8192):
    """Mirrors HungarianMatcher.forward: per-batch cost matrices on TPU."""
    pred_masks, _ = pred["out_masks"]                  # (total_points, Q)
    pred_logits, logit_offset = pred["out_classes"]    # (total_queries, K)
    gt_labels = target["gt_labels"]
    gt_masks = target["gt_masks"]
    offset = target["offset"]

    point_off = [0] + [int(o) for o in offset]
    logit_off = [0] + [int(o) for o in logit_offset]
    batch_size = len(point_off) - 1

    cost_matrices = []
    # TODO(synk): one pallas_call (and one compile per distinct ragged shape)
    # per batch element; production callers should bucket/pad (N, M) or fold
    # the batch into a leading grid axis with scalar-prefetched offsets.
    for b in range(batch_size):
        logits_b = pred_logits[logit_off[b]:logit_off[b + 1]]      # (Q, K)
        pmask_nq = pred_masks[point_off[b]:point_off[b + 1]]       # (N_b, Q)
        C = matcher_cost_matrix(logits_b, pmask_nq, gt_labels[b],
                                gt_masks[b], cost_weight, tile_n=tile_n)
        cost_matrices.append(C)
    # TODO(synk): scipy.optimize.linear_sum_assignment (the Hungarian
    # assignment itself) is a sequential host-side algorithm; the TPU kernel
    # produces the per-batch cost matrices it consumes.
    return cost_matrices


def _reference_cost_matrix(pred_logits_b, pred_mask_b, gt_labels_b, gt_mask_b,
                           cost_weight):
    """Pure-JAX reference with torch semantics (for validation)."""
    prob = jax.nn.softmax(pred_logits_b.astype(jnp.float32), axis=-1)
    cost_class = -prob[:, jnp.asarray(gt_labels_b, jnp.int32)]
    x = pred_mask_b.astype(jnp.float32)
    t = gt_mask_b.astype(jnp.float32)
    n = x.shape[1]
    pos = jax.nn.softplus(-x) * 0.5
    neg = jax.nn.softplus(x) * 0.5
    cost_mask = (pos @ t.T + neg @ (1.0 - t).T) / n
    s = jax.nn.sigmoid(x)
    numer = 2.0 * (s @ t.T)
    denom = s.sum(-1)[:, None] + t.sum(-1)[None, :]
    cost_dice = 1.0 - (numer + 1.0) / (denom + 1.0)
    return (cost_weight[0] * cost_class + cost_weight[1] * cost_mask +
            cost_weight[2] * cost_dice)


if __name__ == "__main__":
    def run_case(Q, K, n_points, n_inst, tile_n, key):
        B = len(n_points)
        total_points = sum(n_points)
        k1, k2, k3, k4 = jax.random.split(key, 4)
        pred_masks = jax.random.normal(k1, (total_points, Q), dtype=jnp.float32)
        pred_logits = jax.random.normal(k2, (B * Q, K), dtype=jnp.float32)
        label_keys = jax.random.split(k3, B)
        mask_keys = jax.random.split(k4, B)
        gt_labels = [jax.random.randint(label_keys[b], (n_inst[b],), 0, K,
                                        dtype=jnp.int32) for b in range(B)]
        gt_masks = [(jax.random.uniform(mask_keys[b], (n_inst[b], n_points[b]))
                     < 0.3).astype(jnp.float32) for b in range(B)]

        offsets = np.cumsum(n_points).tolist()
        pred = {"out_masks": [pred_masks, None],
                "out_classes": [pred_logits, [(b + 1) * Q for b in range(B)]]}
        target = {"gt_labels": gt_labels, "gt_masks": gt_masks,
                  "offset": offsets}
        cost_weight = [0.5, 1.0, 1.0]

        cost_mats = hungarian_matcher_forward(pred, target, cost_weight,
                                              tile_n=tile_n)
        cost_mats = [jax.block_until_ready(c) for c in cost_mats]

        point_off = [0] + offsets
        for b in range(B):
            logits_b = pred_logits[b * Q:(b + 1) * Q]
            pmask_b = pred_masks[point_off[b]:point_off[b + 1]].T
            ref = _reference_cost_matrix(logits_b, pmask_b, gt_labels[b],
                                         gt_masks[b], cost_weight)
            # approx-reciprocal sigmoid differs from the exact reference at the
            # ~1e-3 level; the matcher consumes an argmin, so this is benign.
            np.testing.assert_allclose(np.asarray(cost_mats[b]),
                                       np.asarray(ref), rtol=1e-2, atol=1e-2)

    key = jax.random.PRNGKey(0)
    k_a, k_b, k_c = jax.random.split(key, 3)
    # Small-Q query-major path, gridded with a masked partial last tile.
    run_case(Q=8, K=5, n_points=[160, 224], n_inst=[3, 4], tile_n=128, key=k_a)
    # Same shapes through the single-tile (N <= tile_n) fast path.
    run_case(Q=8, K=5, n_points=[160, 224], n_inst=[3, 4], tile_n=8192, key=k_b)
    # Realistic-Q path: native (N, Q) point-major streaming, parallel Q blocks.
    run_case(Q=256, K=5, n_points=[448], n_inst=[5], tile_n=128, key=k_c)

    print("KERNEL_OK")
</pallas_src>

<mosaic_0001>
module attributes {stable_mosaic.version = 11 : i64} {
  func.func @_qmajor_kernel(%arg0: i32, %arg1: memref<8x5xf32, #tpu.memory_space<vmem>>, %arg2: memref<3x5xf32, #tpu.memory_space<vmem>>, %arg3: memref<1x3xf32, #tpu.memory_space<vmem>>, %arg4: memref<8x128xf32, #tpu.memory_space<vmem>>, %arg5: memref<3x128xf32, #tpu.memory_space<vmem>>, %arg6: memref<8x3xf32, #tpu.memory_space<vmem>>, %arg7: memref<8x3xf32, #tpu.memory_space<vmem>>, %arg8: memref<8x3xf32, #tpu.memory_space<vmem>>, %arg9: memref<8x1xf32, #tpu.memory_space<vmem>>, %arg10: memref<8x1xf32, #tpu.memory_space<vmem>>) attributes {dimension_semantics = [#tpu.dimension_semantics<arbitrary>], iteration_bounds = array<i64: 2>, scalar_prefetch = 0 : i64, scratch_operands = 4 : i64, tpu.core_type = #tpu.core_type<tc>, window_params = [{pipeline_mode = #tpu.pipeline_mode<synchronous>, transform_indices = @transform_0, window_bounds = array<i64: 8, 5>}, {pipeline_mode = #tpu.pipeline_mode<synchronous>, transform_indices = @transform_1, window_bounds = array<i64: 3, 5>}, {pipeline_mode = #tpu.pipeline_mode<synchronous>, transform_indices = @transform_2, window_bounds = array<i64: 1, 3>}, {transform_indices = @transform_3, window_bounds = array<i64: 8, 128>}, {transform_indices = @transform_4, window_bounds = array<i64: 3, 128>}, {pipeline_mode = #tpu.pipeline_mode<synchronous>, transform_indices = @transform_5, window_bounds = array<i64: 8, 3>}]} {
    %c0_i32 = arith.constant 0 : i32
    %0 = arith.cmpi eq, %arg0, %c0_i32 : i32
    %1 = arith.extui %0 : i1 to i32
    %c0_i32_0 = arith.constant 0 : i32
    %2 = arith.cmpi ne, %1, %c0_i32_0 : i32
    scf.if %2 {
      %cst = arith.constant 0.000000e+00 : f32
      %14 = vector.broadcast %cst : f32 to vector<8x3xf32>
      %c0_9 = arith.constant 0 : index
      %c0_10 = arith.constant 0 : index
      %15 = vector.load %arg7[%c0_9, %c0_10] : memref<8x3xf32, #tpu.memory_space<vmem>>, vector<8x3xf32>
      tpu.vector_store %arg7[%c0_9, %c0_10], %14 {strides = array<i32>} : memref<8x3xf32, #tpu.memory_space<vmem>>, vector<8x3xf32>,
      %cst_11 = arith.constant 0.000000e+00 : f32
      %16 = vector.broadcast %cst_11 : f32 to vector<8x3xf32>
      %c0_12 = arith.constant 0 : index
      %c0_13 = arith.constant 0 : index
      %17 = vector.load %arg8[%c0_12, %c0_13] : memref<8x3xf32, #tpu.memory_space<vmem>>, vector<8x3xf32>
      tpu.vector_store %arg8[%c0_12, %c0_13], %16 {strides = array<i32>} : memref<8x3xf32, #tpu.memory_space<vmem>>, vector<8x3xf32>,
      %cst_14 = arith.constant 0.000000e+00 : f32
      %18 = vector.broadcast %cst_14 : f32 to vector<8x1xf32>
      %c0_15 = arith.constant 0 : index
      %c0_16 = arith.constant 0 : index
      %19 = vector.load %arg9[%c0_15, %c0_16] : memref<8x1xf32, #tpu.memory_space<vmem>>, vector<8x1xf32>
      tpu.vector_store %arg9[%c0_15, %c0_16], %18 {strides = array<i32>} : memref<8x1xf32, #tpu.memory_space<vmem>>, vector<8x1xf32>,
      %cst_17 = arith.constant 0.000000e+00 : f32
      %20 = vector.broadcast %cst_17 : f32 to vector<8x1xf32>
      %c0_18 = arith.constant 0 : index
      %c0_19 = arith.constant 0 : index
      %21 = vector.load %arg10[%c0_18, %c0_19] : memref<8x1xf32, #tpu.memory_space<vmem>>, vector<8x1xf32>
      tpu.vector_store %arg10[%c0_18, %c0_19], %20 {strides = array<i32>} : memref<8x1xf32, #tpu.memory_space<vmem>>, vector<8x1xf32>,
    } else {
    }
    %c0 = arith.constant 0 : index
    %c0_1 = arith.constant 0 : index
    %3 = vector.load %arg4[%c0, %c0_1] : memref<8x128xf32, #tpu.memory_space<vmem>>, vector<8x128xf32>
    %c0_2 = arith.constant 0 : index
    %c0_3 = arith.constant 0 : index
    %4 = vector.load %arg5[%c0_2, %c0_3] : memref<3x128xf32, #tpu.memory_space<vmem>>, vector<3x128xf32>
    %c1_i32 = arith.constant 1 : i32
    %5 = arith.cmpi slt, %arg0, %c1_i32 : i32
    %6 = arith.extui %5 : i1 to i32
    %c0_i32_4 = arith.constant 0 : i32
    %7 = arith.cmpi ne, %6, %c0_i32_4 : i32
    scf.if %7 {
      %14 = math.absf %3 : vector<8x128xf32>
      %cst = arith.constant 0.000000e+00 : f32
      %15 = vector.broadcast %cst : f32 to vector<8x128xf32>
      %16 = arith.subf %15, %14 : vector<8x128xf32>
      %17 = math.exp %16 : vector<8x128xf32>
      %cst_9 = arith.constant 1.000000e+00 : f32
      %18 = vector.broadcast %cst_9 : f32 to vector<8x128xf32>
      %19 = arith.addf %18, %17 : vector<8x128xf32>
      %20 = math.log %19 : vector<8x128xf32>
      %cst_10 = arith.constant 0.000000e+00 : f32
      %21 = vector.broadcast %cst_10 : f32 to vector<8x128xf32>
      %22 = arith.maximumf %3, %21 : vector<8x128xf32>
      %23 = arith.addf %22, %20 : vector<8x128xf32>
      %cst_11 = arith.constant 5.000000e-01 : f32
      %24 = vector.broadcast %cst_11 : f32 to vector<8x128xf32>
      %25 = arith.mulf %24, %23 : vector<8x128xf32>
      %cst_12 = arith.constant 1.000000e+00 : f32
      %26 = vector.broadcast %cst_12 : f32 to vector<8x128xf32>
      %27 = arith.addf %26, %17 : vector<8x128xf32>
      %28 = tpu.reciprocal %27 {approx = true} : vector<8x128xf32> -> vector<8x128xf32>
      %cst_13 = arith.constant 0.000000e+00 : f32
      %29 = vector.broadcast %cst_13 : f32 to vector<8x128xf32>
      %30 = arith.cmpf oge, %3, %29 : vector<8x128xf32>
      %31 = arith.mulf %17, %28 : vector<8x128xf32>
      %32 = arith.select %30, %28, %31 : vector<8x128xi1>, vector<8x128xf32>
      %c0_14 = arith.constant 0 : index
      %c0_15 = arith.constant 0 : index
      %33 = vector.load %arg7[%c0_14, %c0_15] : memref<8x3xf32, #tpu.memory_space<vmem>>, vector<8x3xf32>
      %cst_16 = arith.constant dense<0.000000e+00> : vector<8x3xf32>
      %34 = tpu.matmul %3, %4, %cst_16 {dimension_numbers = #tpu.dot_dimension_numbers<[1], [1], [0], [0], [0, 0, 1, 0], [], []>} : vector<8x128xf32>, vector<3x128xf32>, vector<8x3xf32> -> vector<8x3xf32>
      %35 = arith.addf %33, %34 : vector<8x3xf32>
      %c0_17 = arith.constant 0 : index
      %c0_18 = arith.constant 0 : index
      %36 = vector.load %arg7[%c0_17, %c0_18] : memref<8x3xf32, #tpu.memory_space<vmem>>, vector<8x3xf32>
      tpu.vector_store %arg7[%c0_17, %c0_18], %35 {strides = array<i32>} : memref<8x3xf32, #tpu.memory_space<vmem>>, vector<8x3xf32>,
      %c0_19 = arith.constant 0 : index
      %c0_20 = arith.constant 0 : index
      %37 = vector.load %arg8[%c0_19, %c0_20] : memref<8x3xf32, #tpu.memory_space<vmem>>, vector<8x3xf32>
      %cst_21 = arith.constant dense<0.000000e+00> : vector<8x3xf32>
      %38 = tpu.matmul %32, %4, %cst_21 {dimension_numbers = #tpu.dot_dimension_numbers<[1], [1], [0], [0], [0, 0, 1, 0], [], []>} : vector<8x128xf32>, vector<3x128xf32>, vector<8x3xf32> -> vector<8x3xf32>
      %39 = arith.addf %37, %38 : vector<8x3xf32>
      %c0_22 = arith.constant 0 : index
      %c0_23 = arith.constant 0 : index
      %40 = vector.load %arg8[%c0_22, %c0_23] : memref<8x3xf32, #tpu.memory_space<vmem>>, vector<8x3xf32>
      tpu.vector_store %arg8[%c0_22, %c0_23], %39 {strides = array<i32>} : memref<8x3xf32, #tpu.memory_space<vmem>>, vector<8x3xf32>,
      %c0_24 = arith.constant 0 : index
      %c0_25 = arith.constant 0 : index
      %41 = vector.load %arg9[%c0_24, %c0_25] : memref<8x1xf32, #tpu.memory_space<vmem>>, vector<8x1xf32>
      %cst_26 = arith.constant dense<0.000000e+00> : vector<8xf32>
      %42 = vector.multi_reduction <add>, %25, %cst_26 [1] : vector<8x128xf32> to vector<8xf32>
      %43 = vector.shape_cast %42 : vector<8xf32> to vector<8x1xf32>
      %44 = arith.addf %41, %43 : vector<8x1xf32>
      %c0_27 = arith.constant 0 : index
      %c0_28 = arith.constant 0 : index
      %45 = vector.load %arg9[%c0_27, %c0_28] : memref<8x1xf32, #tpu.memory_space<vmem>>, vector<8x1xf32>
      tpu.vector_store %arg9[%c0_27, %c0_28], %44 {strides = array<i32>} : memref<8x1xf32, #tpu.memory_space<vmem>>, vector<8x1xf32>,
      %c0_29 = arith.constant 0 : index
      %c0_30 = arith.constant 0 : index
      %46 = vector.load %arg10[%c0_29, %c0_30] : memref<8x1xf32, #tpu.memory_space<vmem>>, vector<8x1xf32>
      %cst_31 = arith.constant dense<0.000000e+00> : vector<8xf32>
      %47 = vector.multi_reduction <add>, %32, %cst_31 [1] : vector<8x128xf32> to vector<8xf32>
      %48 = vector.shape_cast %47 : vector<8xf32> to vector<8x1xf32>
      %49 = arith.addf %46, %48 : vector<8x1xf32>
      %c0_32 = arith.constant 0 : index
      %c0_33 = arith.constant 0 : index
      %50 = vector.load %arg10[%c0_32, %c0_33] : memref<8x1xf32, #tpu.memory_space<vmem>>, vector<8x1xf32>
      tpu.vector_store %arg10[%c0_32, %c0_33], %49 {strides = array<i32>} : memref<8x1xf32, #tpu.memory_space<vmem>>, vector<8x1xf32>,
    } else {
    }
    %c1_i32_5 = arith.constant 1 : i32
    %8 = arith.cmpi eq, %arg0, %c1_i32_5 : i32
    %9 = arith.extui %8 : i1 to i32
    %c0_i32_6 = arith.constant 0 : i32
    %10 = arith.cmpi ne, %9, %c0_i32_6 : i32
    scf.if %10 {
      %c128_i32 = arith.constant 128 : i32
      %14 = arith.muli %arg0, %c128_i32 : i32
      %15 = tpu.iota {dimensions = array<i32: 1>} : vector<8x128xi32>
      %16 = vector.broadcast %14 : i32 to vector<8x128xi32>
      %17 = arith.addi %15, %16 : vector<8x128xi32>
      %18 = tpu.iota {dimensions = array<i32: 1>} : vector<3x128xi32>
      %19 = vector.broadcast %14 : i32 to vector<3x128xi32>
      %20 = arith.addi %18, %19 : vector<3x128xi32>
      %c160_i32 = arith.constant 160 : i32
      %21 = vector.broadcast %c160_i32 : i32 to vector<8x128xi32>
      %22 = arith.cmpi slt, %17, %21 : vector<8x128xi32>
      %23 = arith.extui %22 : vector<8x128xi1> to vector<8x128xi32>
      %24 = arith.sitofp %23 : vector<8x128xi32> to vector<8x128xf32>
      %c160_i32_9 = arith.constant 160 : i32
      %25 = vector.broadcast %c160_i32_9 : i32 to vector<8x128xi32>
      %26 = arith.cmpi slt, %17, %25 : vector<8x128xi32>
      %cst = arith.constant 0.000000e+00 : f32
      %27 = vector.broadcast %cst : f32 to vector<8x128xf32>
      %28 = arith.select %26, %3, %27 : vector<8x128xi1>, vector<8x128xf32>
      %c160_i32_10 = arith.constant 160 : i32
      %29 = vector.broadcast %c160_i32_10 : i32 to vector<3x128xi32>
      %30 = arith.cmpi slt, %20, %29 : vector<3x128xi32>
      %cst_11 = arith.constant 0.000000e+00 : f32
      %31 = vector.broadcast %cst_11 : f32 to vector<3x128xf32>
      %32 = arith.select %30, %4, %31 : vector<3x128xi1>, vector<3x128xf32>
      %33 = math.absf %28 : vector<8x128xf32>
      %cst_12 = arith.constant 0.000000e+00 : f32
      %34 = vector.broadcast %cst_12 : f32 to vector<8x128xf32>
      %35 = arith.subf %34, %33 : vector<8x128xf32>
      %36 = math.exp %35 : vector<8x128xf32>
      %cst_13 = arith.constant 1.000000e+00 : f32
      %37 = vector.broadcast %cst_13 : f32 to vector<8x128xf32>
      %38 = arith.addf %37, %36 : vector<8x128xf32>
      %39 = math.log %38 : vector<8x128xf32>
      %cst_14 = arith.constant 0.000000e+00 : f32
      %40 = vector.broadcast %cst_14 : f32 to vector<8x128xf32>
      %41 = arith.maximumf %28, %40 : vector<8x128xf32>
      %42 = arith.addf %41, %39 : vector<8x128xf32>
      %cst_15 = arith.constant 5.000000e-01 : f32
      %43 = vector.broadcast %cst_15 : f32 to vector<8x128xf32>
      %44 = arith.mulf %43, %42 : vector<8x128xf32>
      %cst_16 = arith.constant 1.000000e+00 : f32
      %45 = vector.broadcast %cst_16 : f32 to vector<8x128xf32>
      %46 = arith.addf %45, %36 : vector<8x128xf32>
      %47 = tpu.reciprocal %46 {approx = true} : vector<8x128xf32> -> vector<8x128xf32>
      %cst_17 = arith.constant 0.000000e+00 : f32
      %48 = vector.broadcast %cst_17 : f32 to vector<8x128xf32>
      %49 = arith.cmpf oge, %28, %48 : vector<8x128xf32>
      %50 = arith.mulf %36, %47 : vector<8x128xf32>
      %51 = arith.select %49, %47, %50 : vector<8x128xi1>, vector<8x128xf32>
      %52 = arith.mulf %44, %24 : vector<8x128xf32>
      %53 = arith.mulf %51, %24 : vector<8x128xf32>
      %c0_18 = arith.constant 0 : index
      %c0_19 = arith.constant 0 : index
      %54 = vector.load %arg7[%c0_18, %c0_19] : memref<8x3xf32, #tpu.memory_space<vmem>>, vector<8x3xf32>
      %cst_20 = arith.constant dense<0.000000e+00> : vector<8x3xf32>
      %55 = tpu.matmul %28, %32, %cst_20 {dimension_numbers = #tpu.dot_dimension_numbers<[1], [1], [0], [0], [0, 0, 1, 0], [], []>} : vector<8x128xf32>, vector<3x128xf32>, vector<8x3xf32> -> vector<8x3xf32>
      %56 = arith.addf %54, %55 : vector<8x3xf32>
      %c0_21 = arith.constant 0 : index
      %c0_22 = arith.constant 0 : index
      %57 = vector.load %arg7[%c0_21, %c0_22] : memref<8x3xf32, #tpu.memory_space<vmem>>, vector<8x3xf32>
      tpu.vector_store %arg7[%c0_21, %c0_22], %56 {strides = array<i32>} : memref<8x3xf32, #tpu.memory_space<vmem>>, vector<8x3xf32>,
      %c0_23 = arith.constant 0 : index
      %c0_24 = arith.constant 0 : index
      %58 = vector.load %arg8[%c0_23, %c0_24] : memref<8x3xf32, #tpu.memory_space<vmem>>, vector<8x3xf32>
      %cst_25 = arith.constant dense<0.000000e+00> : vector<8x3xf32>
      %59 = tpu.matmul %53, %32, %cst_25 {dimension_numbers = #tpu.dot_dimension_numbers<[1], [1], [0], [0], [0, 0, 1, 0], [], []>} : vector<8x128xf32>, vector<3x128xf32>, vector<8x3xf32> -> vector<8x3xf32>
      %60 = arith.addf %58, %59 : vector<8x3xf32>
      %c0_26 = arith.constant 0 : index
      %c0_27 = arith.constant 0 : index
      %61 = vector.load %arg8[%c0_26, %c0_27] : memref<8x3xf32, #tpu.memory_space<vmem>>, vector<8x3xf32>
      tpu.vector_store %arg8[%c0_26, %c0_27], %60 {strides = array<i32>} : memref<8x3xf32, #tpu.memory_space<vmem>>, vector<8x3xf32>,
      %c0_28 = arith.constant 0 : index
      %c0_29 = arith.constant 0 : index
      %62 = vector.load %arg9[%c0_28, %c0_29] : memref<8x1xf32, #tpu.memory_space<vmem>>, vector<8x1xf32>
      %cst_30 = arith.constant dense<0.000000e+00> : vector<8xf32>
      %63 = vector.multi_reduction <add>, %52, %cst_30 [1] : vector<8x128xf32> to vector<8xf32>
      %64 = vector.shape_cast %63 : vector<8xf32> to vector<8x1xf32>
      %65 = arith.addf %62, %64 : vector<8x1xf32>
      %c0_31 = arith.constant 0 : index
      %c0_32 = arith.constant 0 : index
      %66 = vector.load %arg9[%c0_31, %c0_32] : memref<8x1xf32, #tpu.memory_space<vmem>>, vector<8x1xf32>
      tpu.vector_store %arg9[%c0_31, %c0_32], %65 {strides = array<i32>} : memref<8x1xf32, #tpu.memory_space<vmem>>, vector<8x1xf32>,
      %c0_33 = arith.constant 0 : index
      %c0_34 = arith.constant 0 : index
      %67 = vector.load %arg10[%c0_33, %c0_34] : memref<8x1xf32, #tpu.memory_space<vmem>>, vector<8x1xf32>
      %cst_35 = arith.constant dense<0.000000e+00> : vector<8xf32>
      %68 = vector.multi_reduction <add>, %53, %cst_35 [1] : vector<8x128xf32> to vector<8xf32>
      %69 = vector.shape_cast %68 : vector<8xf32> to vector<8x1xf32>
      %70 = arith.addf %67, %69 : vector<8x1xf32>
      %c0_36 = arith.constant 0 : index
      %c0_37 = arith.constant 0 : index
      %71 = vector.load %arg10[%c0_36, %c0_37] : memref<8x1xf32, #tpu.memory_space<vmem>>, vector<8x1xf32>
      tpu.vector_store %arg10[%c0_36, %c0_37], %70 {strides = array<i32>} : memref<8x1xf32, #tpu.memory_space<vmem>>, vector<8x1xf32>,
    } else {
    }
    %c1_i32_7 = arith.constant 1 : i32
    %11 = arith.cmpi eq, %arg0, %c1_i32_7 : i32
    %12 = arith.extui %11 : i1 to i32
    %c0_i32_8 = arith.constant 0 : i32
    %13 = arith.cmpi ne, %12, %c0_i32_8 : i32
    scf.if %13 {
      %c0_9 = arith.constant 0 : index
      %c0_10 = arith.constant 0 : index
      %14 = vector.load %arg1[%c0_9, %c0_10] : memref<8x5xf32, #tpu.memory_space<vmem>>, vector<8x5xf32>
      %c0_11 = arith.constant 0 : index
      %c0_12 = arith.constant 0 : index
      %15 = vector.load %arg2[%c0_11, %c0_12] : memref<3x5xf32, #tpu.memory_space<vmem>>, vector<3x5xf32>
      %cst = arith.constant dense<0xFF800000> : vector<8xf32>
      %16 = vector.multi_reduction <maximumf>, %14, %cst [1] : vector<8x5xf32> to vector<8xf32>
      %17 = vector.shape_cast %16 : vector<8xf32> to vector<8x1xf32>
      %18 = vector.broadcast %17 : vector<8x1xf32> to vector<8x5xf32>
      %19 = arith.subf %14, %18 : vector<8x5xf32>
      %20 = math.exp %19 : vector<8x5xf32>
      %cst_13 = arith.constant dense<0.000000e+00> : vector<8xf32>
      %21 = vector.multi_reduction <add>, %20, %cst_13 [1] : vector<8x5xf32> to vector<8xf32>
      %22 = vector.shape_cast %21 : vector<8xf32> to vector<8x1xf32>
      %23 = vector.broadcast %22 : vector<8x1xf32> to vector<8x5xf32>
      %24 = arith.divf %20, %23 : vector<8x5xf32>
      %cst_14 = arith.constant dense<0.000000e+00> : vector<8x3xf32>
      %25 = tpu.matmul %24, %15, %cst_14 {dimension_numbers = #tpu.dot_dimension_numbers<[1], [1], [0], [0], [0, 0, 1, 0], [], []>} : vector<8x5xf32>, vector<3x5xf32>, vector<8x3xf32> -> vector<8x3xf32>
      %cst_15 = arith.constant 0.000000e+00 : f32
      %26 = vector.broadcast %cst_15 : f32 to vector<8x3xf32>
      %27 = arith.subf %26, %25 : vector<8x3xf32>
      %c0_16 = arith.constant 0 : index
      %c0_17 = arith.constant 0 : index
      %28 = vector.load %arg9[%c0_16, %c0_17] : memref<8x1xf32, #tpu.memory_space<vmem>>, vector<8x1xf32>
      %c0_18 = arith.constant 0 : index
      %c0_19 = arith.constant 0 : index
      %29 = vector.load %arg7[%c0_18, %c0_19] : memref<8x3xf32, #tpu.memory_space<vmem>>, vector<8x3xf32>
      %cst_20 = arith.constant 5.000000e-01 : f32
      %30 = vector.broadcast %cst_20 : f32 to vector<8x3xf32>
      %31 = arith.mulf %30, %29 : vector<8x3xf32>
      %32 = vector.broadcast %28 : vector<8x1xf32> to vector<8x3xf32>
      %33 = arith.subf %32, %31 : vector<8x3xf32>
      %cst_21 = arith.constant 6.250000e-03 : f32
      %34 = vector.broadcast %cst_21 : f32 to vector<8x3xf32>
      %35 = arith.mulf %33, %34 : vector<8x3xf32>
      %c0_22 = arith.constant 0 : index
      %c0_23 = arith.constant 0 : index
      %36 = vector.load %arg8[%c0_22, %c0_23] : memref<8x3xf32, #tpu.memory_space<vmem>>, vector<8x3xf32>
      %cst_24 = arith.constant 2.000000e+00 : f32
      %37 = vector.broadcast %cst_24 : f32 to vector<8x3xf32>
      %38 = arith.mulf %37, %36 : vector<8x3xf32>
      %c0_25 = arith.constant 0 : index
      %c0_26 = arith.constant 0 : index
      %39 = vector.load %arg10[%c0_25, %c0_26] : memref<8x1xf32, #tpu.memory_space<vmem>>, vector<8x1xf32>
      %c0_27 = arith.constant 0 : index
      %c0_28 = arith.constant 0 : index
      %40 = vector.load %arg3[%c0_27, %c0_28] : memref<1x3xf32, #tpu.memory_space<vmem>>, vector<1x3xf32>
      %41 = vector.broadcast %39 : vector<8x1xf32> to vector<8x3xf32>
      %42 = vector.broadcast %40 : vector<1x3xf32> to vector<8x3xf32>
      %43 = arith.addf %41, %42 : vector<8x3xf32>
      %cst_29 = arith.constant 1.000000e+00 : f32
      %44 = vector.broadcast %cst_29 : f32 to vector<8x3xf32>
      %45 = arith.addf %38, %44 : vector<8x3xf32>
      %cst_30 = arith.constant 1.000000e+00 : f32
      %46 = vector.broadcast %cst_30 : f32 to vector<8x3xf32>
      %47 = arith.addf %43, %46 : vector<8x3xf32>
      %48 = arith.divf %45, %47 : vector<8x3xf32>
      %cst_31 = arith.constant 1.000000e+00 : f32
      %49 = vector.broadcast %cst_31 : f32 to vector<8x3xf32>
      %50 = arith.subf %49, %48 : vector<8x3xf32>
      %cst_32 = arith.constant 5.000000e-01 : f32
      %51 = vector.broadcast %cst_32 : f32 to vector<8x3xf32>
      %52 = arith.mulf %51, %27 : vector<8x3xf32>
      %cst_33 = arith.constant 1.000000e+00 : f32
      %53 = vector.broadcast %cst_33 : f32 to vector<8x3xf32>
      %54 = arith.mulf %53, %35 : vector<8x3xf32>
      %55 = arith.addf %52, %54 : vector<8x3xf32>
      %cst_34 = arith.constant 1.000000e+00 : f32
      %56 = vector.broadcast %cst_34 : f32 to vector<8x3xf32>
      %57 = arith.mulf %56, %50 : vector<8x3xf32>
      %58 = arith.addf %55, %57 : vector<8x3xf32>
      %c0_35 = arith.constant 0 : index
      %c0_36 = arith.constant 0 : index
      %59 = vector.load %arg6[%c0_35, %c0_36] : memref<8x3xf32, #tpu.memory_space<vmem>>, vector<8x3xf32>
      tpu.vector_store %arg6[%c0_35, %c0_36], %58 {strides = array<i32>} : memref<8x3xf32, #tpu.memory_space<vmem>>, vector<8x3xf32>,
    } else {
    }
    return
  }
  func.func @transform_0(%arg0: i32) -> (i32, i32) {
    %c0_i32 = arith.constant 0 : i32
    %c0_i32_0 = arith.constant 0 : i32
    %c0_i32_1 = arith.constant 0 : i32
    return %c0_i32, %c0_i32_0 : i32, i32
  }
  func.func @transform_1(%arg0: i32) -> (i32, i32) {
    %c0_i32 = arith.constant 0 : i32
    %c0_i32_0 = arith.constant 0 : i32
    %c0_i32_1 = arith.constant 0 : i32
    return %c0_i32, %c0_i32_0 : i32, i32
  }
  func.func @transform_2(%arg0: i32) -> (i32, i32) {
    %c0_i32 = arith.constant 0 : i32
    %c0_i32_0 = arith.constant 0 : i32
    %c0_i32_1 = arith.constant 0 : i32
    return %c0_i32, %c0_i32_0 : i32, i32
  }
  func.func @transform_3(%arg0: i32) -> (i32, i32) {
    %c0_i32 = arith.constant 0 : i32
    %c0_i32_0 = arith.constant 0 : i32
    return %c0_i32, %arg0 : i32, i32
  }
  func.func @transform_4(%arg0: i32) -> (i32, i32) {
    %c0_i32 = arith.constant 0 : i32
    %c0_i32_0 = arith.constant 0 : i32
    return %c0_i32, %arg0 : i32, i32
  }
  func.func @transform_5(%arg0: i32) -> (i32, i32) {
    %c0_i32 = arith.constant 0 : i32
    %c0_i32_0 = arith.constant 0 : i32
    %c0_i32_1 = arith.constant 0 : i32
    return %c0_i32, %c0_i32_0 : i32, i32
  }
}

</mosaic_0001>

<bundles_post_ra>
// kernel: tpu_custom_call.1
= control target key start
LH: loop header
LB: loop body
LE: loop exit
PB: predicated region body
PF: predicated region fallthrough
CT: control target
= control target key end

     0   :  { %10 = vsyncpa [#allocation7], 0  ;;  %s1423_s0 = inlined_call_operand.hbm [shape: f32[8,5], index: 0, kind: input, shape index: {}]   ;;  %s1424_s1 = inlined_call_operand.hbm [shape: f32[3,5], index: 1, kind: input, shape index: {}]   ;;  %s1425_s2 = inlined_call_operand.vmem [shape: f32[1,3], index: 2, kind: input, shape index: {}]   ;;  %s1426_s3 = inlined_call_operand.hbm [shape: f32[8,160], index: 3, kind: input, shape index: {}]   ;;  %s1427_s4 = inlined_call_operand.hbm [shape: f32[3,160], index: 4, kind: input, shape index: {}]   ;;  %s1428_s5 = inlined_call_operand.vmem [shape: f32[8,3], index: 5, kind: output, shape index: {}]  }
   0x1   :  { %11 = vsyncpa [#allocation9], 0  ;;  %s1209_s18 = smov 0   ;;  %s1211_s19 = smov 0  }
   0x2   :  { %s1213_s20 = smov 0   ;;  %s1215_s21 = smov 0  }
   0x3 LB: > { %s1228_s22 = sadd.s32 4294967295, %s1167_s21   ;;  %p100_p0 = scmp.ne.s32.totalorder %s1159_s19, %s1155_s18  ;;  %s1167_s21 = sphi %s1215_s21, %s1449_s21   ;;  %s1163_s20 = sphi %s1213_s20, %s1448_s20   ;;  %s1159_s19 = sphi %s1211_s19, %s1447_s19   ;;  %s1155_s18 = sphi %s1209_s18, %s1446_s18  }
   0x4   : > { %p1429_p1 = scmp.eq.s32.totalorder %s1228_s22, 0  ;;  %p865_p2 = scmp.ge.s32.totalorder %s1167_s21, 1 }
   0x5   : > { %p158_p3 = scmp.lt.s32.totalorder %s1167_s21, 3  ;;  %s1169_s25 = smov [#allocation6]  }
   0x6   : > { %p1237_p5 = por %p1429_p1, %p100_p0  ;;  %s171_s26 = sshll.u32 %s1169_s25, 4  ;;  %s172_s26 = int_to_ptr.vmem [resolvable:$true] %s171_s26 }
   0x7   : > { %p1241_p6 = pnand %p865_p2, %p158_p3  ;;  %s1248_s27 = sadd.s32 1, %s1167_s21  }
   0x8   : > { %s1433_s23 = scalar_select %p1237_p5, 1, 0 }
   0x9   : > { %s1434_s24 = scalar_select %p1241_p6, 1, 0 }
   0xa   : > { %p938_p7 = pneg %p1241_p6  ;;  %s84_s29 = ssub.s32 %s1167_s21, %s1248_s27 }
   0xb   : > { %p1258_p9 = scmp.eq.s32.totalorder %s84_s29, 0  ;;  %s87_s6 = sadd.s32 1, %s1163_s20 }
   0xc   : > { %p1252_p8 = pnand %p938_p7, %p1429_p1  ;;  %p94_p10 = scmp.ne.s32.totalorder %s1163_s20, %s1159_s19 }
   0xd   : > { %s1028_s7 = scalar_lea.vmem %s172_s26, 128  ;;  %p1036_p2 = scmp.lt.s32.totalorder %s172_s26, %s172_s26 }
   0xe   : > { %p1430_p11 = pneg %p1252_p8  ;;  %p1029_p12 = scmp.ne.s32.totalorder %s172_s26, %s1028_s7 }
   0xf   : > { %p1037_p3 = scmp.lt.s32.totalorder %s1028_s7, %s1028_s7 }
  0x10   : > { %p1031_p13 = pnand %p1029_p12, %p1430_p11 }
  0x11   : > { %p1038_p7 = por %p1037_p3, %p1036_p2 }
  0x12   : > { %p1032_p0 = pneg %p1031_p13 }
  0x14   : > { %p1039_p4 = pnand %p1038_p7, %p1032_p0 }
  0x16   : > { %1042 = shalt.err (!%p1039_p4)
}
  0x17   : > { %941 = dma.hbm_to_vmem [thread:$0]  (!%p1252_p8), %s1423_s0, 128, %s172_s26, [#allocation7]  }
  0x18   : > { %s1278_s10 = scalar_select %p1258_p9, %s1163_s20, %s87_s6  }
  0x19   : > { %p95_p4 = scmp.eq.s32.totalorder %s1167_s21, 0  ;;  %p954_p12 = scmp.lt.s32.totalorder %s1167_s21, 2 }
  0x1a   : > { %s196_s11 = sand.u32 1, %s1167_s21   ;;  %s198_s12 = sand.u32 1, %s1163_s20  }
  0x1b   : > { %p96_p13 = por %p95_p4, %p94_p10  ;;  %s869_s13 = sshll.u32 %s198_s12, 3 }
  0x1c   : > { %s870_s14 = sshll.u32 %s1167_s21, 7  ;;  %s200_s18 = scalar_lea.vmem [#allocation10], %s869_s13 }
  0x1d   : > { %s1293_s17 = scalar_lea.hbm %s1426_s3, %s870_s14  ;;  %s207_s25 = sshll.u32 %s200_s18, 4  ;;  %s1299_s25 = int_to_ptr.vmem [resolvable:$true] %s207_s25 }
  0x1e   : > { %p1295_p9 = pnand %p954_p12, %p96_p13  ;;  %s1170_s29 = smov [#allocation8]  }
  0x1f   : > { %s182_s30 = sshll.u32 %s1170_s29, 4  ;;  %s1301_s6 = scalar_lea.sflag [#allocation7], %s196_s11  ;;  %s183_s30 = int_to_ptr.vmem [resolvable:$true] %s182_s30 }
  0x20   : > { %s1043_s7 = scalar_lea.hbm %s1293_s17, 128  ;;  %p1045_p0 = pneg %p1295_p9 }
  0x21   : > { %p1044_p10 = scmp.ne.s32.totalorder %s1293_s17, %s1043_s7  ;;  %s1048_s13 = scalar_lea.hbm %s1426_s3, 256 }
  0x22   : > { %p1049_p7 = scmp.lt.s32.totalorder %s1293_s17, %s1426_s3  ;;  %p1050_p4 = scmp.lt.s32.totalorder %s1048_s13, %s1043_s7 }
  0x23   : > { %p1046_p2 = pnand %p1045_p0, %p1044_p10 }
  0x24   : > { %p1051_p12 = por %p1050_p4, %p1049_p7 }
  0x25   : > { %p1047_p3 = pneg %p1046_p2 }
  0x27   : > { %p1052_p13 = pnand %p1051_p12, %p1047_p3 }
  0x29   : > { %1055 = shalt.err (!%p1052_p13)
}
  0x2a   : > { %s1056_s11 = scalar_lea.vmem %s1299_s25, 128  ;;  %s1171_s16 = smov [#allocation10]  }
  0x2b   : > { %p1057_p1 = scmp.ne.s32.totalorder %s1299_s25, %s1056_s11  ;;  %s1061_s18 = sshll.u32 %s1171_s16, 4  ;;  %s1062_s18 = int_to_ptr.vmem [resolvable:$false] %s1061_s18 }
  0x2c   : > { %s1063_s29 = scalar_lea.vmem %s1062_s18, 256  ;;  %p1064_p11 = scmp.lt.s32.totalorder %s1299_s25, %s1062_s18 }
  0x2d   : > { %p1059_p10 = pnand %p1057_p1, %p1045_p0  ;;  %p1065_p5 = scmp.lt.s32.totalorder %s1063_s29, %s1056_s11 }
  0x2f   : > { %p1060_p2 = pneg %p1059_p10  ;;  %p1066_p6 = por %p1065_p5, %p1064_p11 }
  0x31   : > { %p1067_p7 = pnand %p1066_p6, %p1060_p2 }
  0x33   : > { %1070 = shalt.err (!%p1067_p7)
}
  0x34   : > { %948 = dma.hbm_to_vmem [thread:$0]  (!%p1295_p9), %s1293_s17, 128, %s1299_s25, %s1301_s6  }
  0x35   : > { %s871_s7 = sshll.u32 %s198_s12, 2  ;;  %s1082_s8 = scalar_lea.vmem %s183_s30, 64 }
  0x36   : > { %p1083_p1 = scmp.ne.s32.totalorder %s183_s30, %s1082_s8  ;;  %p1438_p3 = pneg %p1252_p8 }
  0x37   : > { %p1090_p5 = scmp.lt.s32.totalorder %s183_s30, %s183_s30  ;;  %p1091_p6 = scmp.lt.s32.totalorder %s1082_s8, %s1082_s8 }
  0x38   : > { %p1085_p4 = pnand %p1083_p1, %p1438_p3 }
  0x39   : > { %p1092_p11 = por %p1091_p6, %p1090_p5 }
  0x3a   : > { %p1086_p12 = pneg %p1085_p4 }
  0x3c   : > { %p1093_p13 = pnand %p1092_p11, %p1086_p12 }
  0x3e   : > { %1096 = shalt.err (!%p1093_p13)
}
  0x3f   : > { %944 = dma.hbm_to_vmem [thread:$0]  (!%p1252_p8), %s1424_s1, 64, %s183_s30, [#allocation9]  }
  0x40   : > { %s872_s12 = sshll.u32 %s1167_s21, 6  ;;  %s218_s15 = scalar_lea.vmem [#allocation11], %s871_s7 }
  0x41   : > { %s223_s14 = scalar_lea.hbm %s1427_s4, %s872_s12  ;;  %s225_s11 = sshll.u32 %s218_s15, 4  ;;  %s226_s11 = int_to_ptr.vmem [resolvable:$true] %s225_s11 }
  0x42   : > { %s1097_s16 = scalar_lea.hbm %s223_s14, 64  ;;  %s1102_s29 = scalar_lea.hbm %s1427_s4, 128 }
  0x43   : > { %p1098_p10 = scmp.ne.s32.totalorder %s223_s14, %s1097_s16  ;;  %p1103_p8 = scmp.lt.s32.totalorder %s223_s14, %s1427_s4 }
  0x44   : > { %p1104_p1 = scmp.lt.s32.totalorder %s1102_s29, %s1097_s16 }
  0x45   : > { %p1100_p2 = pnand %p1098_p10, %p1045_p0 }
  0x46   : > { %p1105_p3 = por %p1104_p1, %p1103_p8 }
  0x47   : > { %p1101_p7 = pneg %p1100_p2 }
  0x49   : > { %p1106_p4 = pnand %p1105_p3, %p1101_p7 }
  0x4b   : > { %1109 = shalt.err (!%p1106_p4)
}
  0x4c   : > { %s1110_s21 = scalar_lea.vmem %s226_s11, 64  ;;  %s1172_s7 = smov [#allocation11]  }
  0x4d   : > { %p1111_p12 = scmp.ne.s32.totalorder %s226_s11, %s1110_s21  ;;  %s1115_s9 = sshll.u32 %s1172_s7, 4  ;;  %s1116_s9 = int_to_ptr.vmem [resolvable:$false] %s1115_s9 }
  0x4e   : > { %s1117_s13 = scalar_lea.vmem %s1116_s9, 128  ;;  %p1118_p11 = scmp.lt.s32.totalorder %s226_s11, %s1116_s9 }
  0x4f   : > { %p1113_p5 = pnand %p1111_p12, %p1045_p0  ;;  %p1119_p13 = scmp.lt.s32.totalorder %s1117_s13, %s1110_s21 }
  0x51   : > { %p1114_p6 = pneg %p1113_p5  ;;  %p1120_p10 = por %p1119_p13, %p1118_p11 }
  0x53   : > { %p1121_p2 = pnand %p1120_p10, %p1114_p6 }
  0x55   : > { %1124 = shalt.err (!%p1121_p2)
}
  0x56   : > { %951 = dma.hbm_to_vmem [thread:$0]  (!%p1295_p9), %s223_s14, 64, %s226_s11, %s1301_s6  }
  0x57   : > { %p1439_p7 = scmp.ne.s32.totalorder %s1434_s24, 0 }
  0x58   : > { %p1440_p8 = scmp.eq.s32.totalorder (!%p1439_p7), %s1228_s22, 0 }
  0x59   : > { %234 = sbr.rel (%p1439_p7) target bundleno = 878 (0x36e), region = 40 }
  0x5e   : > { %1142 = dma.done.wait (%p1440_p8), [#allocation7], 128   ;;  %p1441_p0 = pmov %p1440_p8 }
  0x60   : > { %1144 = vsyncadd (%p1441_p0), [#allocation7], 4294967168  ;;  %p1442_p1 = pmov %p1441_p0 }
  0x61   : > { %p1443_p3 = pmov %p1441_p0 }
  0x62   : > { %1146 = dma.done.wait (%p1442_p1), [#allocation9], 64  }
  0x63   : > { %1148 = vsyncadd (%p1443_p3), [#allocation9], 4294967232  ;;  %s244_s26 = sand.u32 1, %s1228_s22   ;;  %s246_s6 = sand.u32 1, %s1159_s19  }
  0x64   : > { %s876_s12 = sshll.u32 %s246_s6, 3  ;;  %s245_s24 = scalar_lea.sflag [#allocation7], %s244_s26 }
  0x65   : > { %s248_s17 = scalar_lea.vmem [#allocation10], %s876_s12  ;;  %p1444_p9 = scmp.ne.s32.totalorder %s1433_s23, 0 }
  0x67   : > { %1150 = dma.done.wait (%p1444_p9), %s245_s24, 192  }
  0x68   : > { %1152 = vsyncadd (%p1444_p9), %s245_s24, 4294967104  ;;  %s877_s25 = sshll.u32 %s246_s6, 2  ;;  %p1445_p4 = scmp.ne.s32.totalorder %s1228_s22, 0 }
  0x69   : > { %s257_s14 = scalar_lea.vmem [#allocation11], %s877_s25 }
  0x6a   : > { %287 = sbr.rel (%p1445_p4) target bundleno = 114 (0x72), region = 60 }
  0x6f   : > { %vm288_vm0 = vcmask 23552   ;;  %vm291_vm1 = vcmask 7168   ;;  %v1173_v0 = vmov 0.0  }
  0x70   : > { %289 = vst.msk [vmem:[#allocation2] sm:$0xff] %vm288_vm0, %v1173_v0  ;;  %290 = vst.msk [vmem:[#allocation3] sm:$0xff] %vm288_vm0, %v1173_v0 }
  0x71   : > { %292 = vst.msk [vmem:[#allocation4] sm:$0xff] %vm291_vm1, %v1173_v0  ;;  %293 = vst.msk [vmem:[#allocation5] sm:$0xff] %vm291_vm1, %v1173_v0 }
  0x72 PF: > { %v1375_v1 = vld [vmem:[%s248_s17] sm:$0xff]  ;;  %v1377_v2 = vld [vmem:[%s257_s14] sm:$0x7]  ;;  %p879_p12 = scmp.ge.s32.totalorder %s1228_s22, 1 }
  0x74   : > { %299 = sbr.rel (%p879_p12) target bundleno = 356 (0x164), region = 64 }
  0x79   : > { %v300_v3 = vand.u32 2147483647, %v1375_v1  ;;  %v1174_v4 = vmov 0.0   ;;  %vm1175_vm2 = vmmov 0   ;;  %vm311_vm3 = vcmp.ge.f32.partialorder %v1375_v1, 0.0  ;;  %v461_v17 = vld [vmem:[#allocation4] sm:$0xff] }
  0x7a   : > { %901 = vmatprep.subr.mxu0 %v1174_v4  ;;  %906 = vmatprep.subr.mxu1 %v1174_v4  ;;  %v307_v10 = vmax.f32 %v1375_v1, 0.0  ;;  %vm465_vm4 = vcmask 7168   ;;  %v467_v20 = vld [vmem:[#allocation5] sm:$0xff]  ;;  %v314_v23 = vld [vmem:[#allocation2] sm:$0xff]  ;;  %vm386_vm5 = vcmask 23552   ;;  %v388_v27 = vld [vmem:[#allocation3] sm:$0xff] }
  0x7b   : > { %902 = vmatpush3.xpose.msra.mxu0 %v1377_v2  ;;  %903 = vmatprep.mubr.msk.f32.mxu0 %vm1175_vm2, %v1174_v4  ;;  %v301_v5 = vsub.f32 0.0, %v300_v3 }
  0x7c   : > { %907 = vmatpush3.xpose.msra.mxu1 %v1377_v2  ;;  %908 = vmatprep.mubr.msk.f32.mxu1 %vm1175_vm2, %v1174_v4 }
  0x7d   : > { %v302_v6 = vmul.f32 1.442695, %v301_v5 }
  0x7e   : > { %904 = vmatmul.mubr.f32.vlgmr.msra.gmra.mxu0 %v1375_v1 }
  0x7f   : > { %997 = vpow2.f32 %v302_v6 }
  0x8c   : > { %v998_v7 = vpop.eup %997 }
  0x8d   : > { %v304_v8 = vadd.f32 1.0, %v998_v7 }
  0x8f   : > { %999 = vrcp.f32 %v304_v8 }
  0x90   : > { %1001 = vlog2.f32 %v304_v8 }
  0x9c   : > { %v1000_v9 = vpop.eup %999 }
  0x9d   : > { %v1002_v11 = vpop.eup %1001  ;;  %v312_v12 = vmul.f32 %v1000_v9, %v998_v7 }
  0x9e   : > { %v306_v13 = vmul.f32 0.6931472, %v1002_v11 }
  0x9f   : > { %v313_v14 = vsel %vm311_vm3, %v1000_v9, %v312_v12 }
  0xa0   : > { %909 = vmatmul.mubr.f32.vlgmr.msra.gmra.mxu1 %v313_v14  ;;  %v308_v15 = vadd.f32 %v307_v10, %v306_v13 }
  0xa2   : > { %v309_v16 = vmul.f32 0.5, %v308_v15 }
  0xa4   : > { %462 = vadd.xlane.f32.xlu0 %v309_v16 }
  0xa8   : > { %468 = vadd.xlane.f32.xlu0 %v313_v14 }
 0x12d   : > { %v463_v18 = vpop.xlane.xlu0 %462 }
 0x12e   : > { %v464_v19 = vadd.f32 %v463_v18, %v461_v17 }
 0x130   : > { %466 = vst.msk [vmem:[#allocation4] sm:$0xff] %vm465_vm4, %v464_v19 }
 0x131   : > { %v469_v21 = vpop.xlane.xlu0 %468 }
 0x132   : > { %v470_v22 = vadd.f32 %v469_v21, %v467_v20 }
 0x134   : > { %471 = vst.msk [vmem:[#allocation5] sm:$0xff] %vm465_vm4, %v470_v22 }
 0x13e   : > { %v381_v24 = vpop.f32.mrf.mxu0 }
 0x13f   : > { %v385_v25 = vadd.f32 %v381_v24, %v314_v23 }
 0x140   : > { %v905_v26 = vpop.f32.mrf.mxu0 }
 0x141   : > { %387 = vst.msk [vmem:[#allocation2] sm:$0xff] %vm386_vm5, %v385_v25 }
 0x160   : > { %v455_v28 = vpop.f32.mrf.mxu1 }
 0x161   : > { %v459_v29 = vadd.f32 %v455_v28, %v388_v27 }
 0x162   : > { %v910_v30 = vpop.f32.mrf.mxu1 }
 0x163   : > { %460 = vst.msk [vmem:[#allocation3] sm:$0xff] %vm386_vm5, %v459_v29 }
 0x164 PF: > { %p880_p5 = scmp.ne.s32.totalorder %s1228_s22, 1 }
 0x165   : > { %s881_s23 = sshll.u32 (!%p880_p5), %s1228_s22, 7 }
 0x166   : > { %475 = sbr.rel (%p880_p5) target bundleno = 878 (0x36e), region = 68 }
 0x16b   : > { %v660_v31 = vld [vmem:[#allocation6] sm:$0xff]  ;;  %vm662_vm6 = vcmask 39936   ;;  %v477_v33 = vlaneseq  ;;  %v479_v34 = vstv %s881_s23  ;;  %v1176_v35 = vmov 0.0   ;;  %v661_v60 = vld [vmem:[#allocation8] sm:$0x7]  ;;  %v655_v62 = vld [vmem:[#allocation5] sm:$0xff] }
 0x16c   : > { %v663_v32 = vsel %vm662_vm6, %v660_v31, -inf  ;;  %911 = vmatprep.subr.mxu0 %v1176_v35  ;;  %916 = vmatprep.subr.mxu1 %v1176_v35  ;;  %vm1177_vm9 = vmmov 0   ;;  %v1178_v61 = vmov 0   ;;  %vm653_vm10 = vcmask 7168   ;;  %v502_v9 = vld [vmem:[#allocation2] sm:$0xff]  ;;  %v576_v10 = vld [vmem:[#allocation3] sm:$0xff] }
 0x16d   : > { %664 = vmax.xlane.f32.xlu0 %v663_v32  ;;  %v478_v36 = vand.u32 127, %v477_v33  ;;  %913 = vmatprep.mubr.msk.f32.mxu0 %vm1177_vm9, %v1176_v35  ;;  %vm574_vm11 = vcmask 23552   ;;  %v888_v17 = vld [vmem:[%s1425_s2] ss:$0 sm:$0xff] }
 0x16e   : > { %918 = vmatprep.mubr.msk.f32.mxu1 %vm1177_vm9, %v1176_v35  ;;  %1003 = vset.pattern.permute.xlu0 %v1178_v61 }
 0x16f   : > { %v480_v37 = vadd.s32 %v479_v34, %v478_v36  ;;  %1004 = vset.pattern.permute.xlu1 %v1178_v61 }
 0x171   : > { %vm481_vm7 = vcmp.lt.s32.totalorder %v480_v37, 160 }
 0x172   : > { %v484_v38 = vsel %vm481_vm7, %v1375_v1, 0.0  ;;  %912 = vmatpush3.xpose.msk.msra.mxu0 %vm481_vm7, %v1377_v2  ;;  %917 = vmatpush3.xpose.msk.msra.mxu1 %vm481_vm7, %v1377_v2  ;;  %v882_v47 = vsel %vm481_vm7, 1.0, %v1176_v35  ;;  %v649_v2 = vld [vmem:[#allocation4] sm:$0xff] }
 0x173   : > { %v486_v39 = vand.u32 2147483647, %v484_v38  ;;  %921 = vmatprep.subr.mxu0 %v1176_v35  ;;  %vm497_vm8 = vcmp.ge.f32.partialorder %v484_v38, 0.0  ;;  %v493_v45 = vmax.f32 %v484_v38, 0.0 }
 0x175   : > { %v487_v40 = vsub.f32 0.0, %v486_v39  ;;  %914 = vmatmul.mubr.msk.f32.vlgmr.msra.gmra.mxu0 %vm481_vm7, %v1375_v1 }
 0x176   : > { %922 = vmatpush3.xpose.msk.msra.mxu0 %vm662_vm6, %v661_v60  ;;  %923 = vmatprep.mubr.msk.f32.mxu0 %vm1177_vm9, %v1176_v35 }
 0x177   : > { %v488_v41 = vmul.f32 1.442695, %v487_v40 }
 0x179   : > { %1005 = vpow2.f32 %v488_v41 }
 0x186   : > { %v1006_v42 = vpop.eup %1005 }
 0x187   : > { %v490_v43 = vadd.f32 1.0, %v1006_v42 }
 0x189   : > { %1007 = vrcp.f32 %v490_v43 }
 0x18a   : > { %1009 = vlog2.f32 %v490_v43 }
 0x196   : > { %v1008_v44 = vpop.eup %1007 }
 0x197   : > { %v1010_v46 = vpop.eup %1009  ;;  %v498_v48 = vmul.f32 %v1008_v44, %v1006_v42 }
 0x198   : > { %v492_v49 = vmul.f32 0.6931472, %v1010_v46 }
 0x199   : > { %v499_v50 = vsel %vm497_vm8, %v1008_v44, %v498_v48 }
 0x19a   : > { %v501_v51 = vmul.f32 %v882_v47, %v499_v50  ;;  %v494_v52 = vadd.f32 %v493_v45, %v492_v49 }
 0x19c   : > { %656 = vadd.xlane.f32.xlu1 %v501_v51  ;;  %v495_v53 = vmul.f32 0.5, %v494_v52  ;;  %919 = vmatmul.mubr.f32.vlgmr.msra.gmra.mxu1 %v501_v51 }
 0x19e   : > { %v500_v54 = vmul.f32 %v882_v47, %v495_v53 }
 0x1a0   : > { %650 = vadd.xlane.f32.xlu1 %v500_v54 }
 0x1f6   : > { %v665_v55 = vpop.xlane.xlu0 %664 }
 0x1f7   : > { %v666_v56 = vsub.f32 %v660_v31, %v665_v55 }
 0x1f9   : > { %v667_v57 = vmul.f32 1.442695, %v666_v56 }
 0x1fb   : > { %1011 = vpow2.f32 %v667_v57 }
 0x208   : > { %v1012_v58 = vpop.eup %1011 }
 0x209   : > { %v669_v59 = vsel %vm662_vm6, %v1012_v58, 0.0 }
 0x20a   : > { %670 = vadd.xlane.f32.xlu0 %v669_v59 }
 0x225   : > { %v657_v63 = vpop.xlane.xlu1 %656 }
 0x226   : > { %v658_v0 = vadd.f32 %v657_v63, %v655_v62 }
 0x228   : > { %659 = vst.msk [vmem:[#allocation5] sm:$0xff] %vm653_vm10, %v658_v0 }
 0x229   : > { %v651_v3 = vpop.xlane.xlu1 %650 }
 0x22a   : > { %v652_v4 = vadd.f32 %v651_v3, %v649_v2 }
 0x22c   : > { %654 = vst.msk [vmem:[#allocation4] sm:$0xff] %vm653_vm10, %v652_v4 }
 0x22f   : > { %v763_v5 = vld [vmem:[#allocation5] sm:$0xff] }
 0x230   : > { %767 = vperm.xlu0 %1003, %v763_v5  }
 0x233   : > { %v751_v6 = vld [vmem:[#allocation4] sm:$0xff] }
 0x234   : > { %756 = vperm.xlu1 %1004, %v751_v6  }
 0x235   : > { %v569_v11 = vpop.f32.mrf.mxu0 }
 0x236   : > { %v573_v13 = vadd.f32 %v569_v11, %v502_v9 }
 0x237   : > { %v915_v15 = vpop.f32.mrf.mxu0 }
 0x238   : > { %575 = vst.msk [vmem:[#allocation2] sm:$0xff] %vm574_vm11, %v573_v13 }
 0x23f   : > { %v752_v22 = vld [vmem:[#allocation2] sm:$0xff] }
 0x240   : > { %v753_v24 = vmul.f32 0.5, %v752_v22 }
 0x25c   : > { %v643_v12 = vpop.f32.mrf.mxu1 }
 0x25d   : > { %v647_v14 = vadd.f32 %v643_v12, %v576_v10 }
 0x25e   : > { %v920_v16 = vpop.f32.mrf.mxu1 }
 0x25f   : > { %648 = vst.msk [vmem:[#allocation3] sm:$0xff] %vm574_vm11, %v647_v14 }
 0x266   : > { %v761_v21 = vld [vmem:[#allocation3] sm:$0xff] }
 0x267   : > { %v762_v23 = vmul.f32 2.0, %v761_v21 }
 0x269   : > { %v777_v26 = vadd.f32 1.0, %v762_v23 }
 0x293   : > { %v671_v1 = vpop.xlane.xlu0 %670 }
 0x294   : > { %1013 = vrcp.f32 %v671_v1 }
 0x2a1   : > { %v1014_v7 = vpop.eup %1013 }
 0x2a2   : > { %v673_v8 = vmul.f32 %v1014_v7, %v1012_v58 }
 0x2a4   : > { %924 = vmatmul.mubr.msk.f32.vlgmr.msra.gmra.mxu0 %vm662_vm6, %v673_v8 }
 0x2ab   : > { %v768_v18 = vpop.permute.xlu0 %767 }
 0x2ac   : > { %v776_v19 = vadd.f32 %v888_v17, %v768_v18 }
 0x2ae   : > { %v778_v20 = vadd.f32 1.0, %v776_v19 }
 0x2af   : > { %v757_v25 = vpop.permute.xlu1 %756 }
 0x2b0   : > { %1015 = vrcp.f32 %v778_v20  ;;  %v759_v28 = vsub.f32 %v757_v25, %v753_v24 }
 0x2b2   : > { %v760_v32 = vmul.f32 0.00625, %v759_v28 }
 0x2bd   : > { %v1016_v27 = vpop.eup %1015 }
 0x2be   : > { %v780_v29 = vmul.f32 %v1016_v27, %v777_v26 }
 0x2c0   : > { %v781_v35 = vsub.f32 1.0, %v780_v29 }
 0x364   : > { %v746_v30 = vpop.f32.mrf.mxu0 }
 0x365   : > { %v750_v31 = vsub.f32 0.0, %v746_v30 }
 0x366   : > { %v925_v33 = vpop.f32.mrf.mxu0 }
 0x367   : > { %v782_v34 = vmul.f32 0.5, %v750_v31 }
 0x369   : > { %v783_v36 = vadd.f32 %v782_v34, %v760_v32 }
 0x36b   : > { %v784_v37 = vadd.f32 %v783_v36, %v781_v35 }
 0x36d   : > { %785 = vst.msk [vmem:[%s1428_s5] sm:$0xff] %vm574_vm11, %v784_v37 }
 0x36e PF: > { %p14_p6 = scmp.ge.s32.totalorder %s1248_s27, 4   ;;  %s1446_s18 = smov %s1159_s19 }
 0x36f   : > { %s1447_s19 = smov %s1163_s20  ;;  %s1448_s20 = smov %s1278_s10 }
 0x370   : > { %s1449_s21 = smov %s1248_s27  ;;  %16 = sbr.rel (!%p14_p6) target bundleno = 3 (0x3), region = 106 }
 0x375   :  { %797 = vsyncpa [#allocation7], 1 }
 0x376   :  { %799 = vsyncpa [#allocation7 + $0x1], 1 }
 0x377   :  { %800 = vsyncpa [#allocation9], 1 }

</bundles_post_ra>
